<compile_context>
chip_gen: v7x
topology: tpu7x:2x2x1
jax: 0.10.0
libtpu: 0.0.40
codegen_flags: <defaults>
</compile_context>

<pallas_src>
import math
import jax
import jax.numpy as jnp
import numpy as np
from jax.experimental import pallas as pl
from jax.experimental.pallas import tpu as pltpu

# --------------------------- configuration (small, deterministic) ---------------------------
BS, QS, KS, ML = 2, 8, 8, 8           # batch, query len, new kv len, memory len
N_HEAD, HEAD_DIM = 4, 8
HIDDEN = N_HEAD * HEAD_DIM            # 32 (layer_norm(hidden) requires hidden == n_head*head_dim)
ND = N_HEAD * HEAD_DIM                # 32
TWO_ND = 2 * ND                       # 64
KT = ML + KS                          # total key length = 16
PACK = BS * N_HEAD * KT               # packed score lane width = 128 (lane-dense)
CAT = BS * ND                         # batch-in-lanes feature width = 64
NUM_BUCKETS = 32                      # relative_attention_num_buckets
MAXLEN = 64                           # maxlen (max_distance)
IS_DECODER = False
LN_EPS = 1e-5
SCALE = 1.0 / (HEAD_DIM ** 0.5)


# ------------------------------------ Pallas kernel ------------------------------------
def _rel_mha_kernel(q_ref, kv_ref, memk_ref, memv_ref, bias_ref, mask_ref, bd_ref,
                    wq_ref, wk_ref, wv_ref, gamma_ref, beta_ref,
                    out_ref, kproj_ref, vproj_ref, score_ref):
    # refs (single grid step; batch folded into the LANE axis):
    #   q_ref     (QS, BS*HIDDEN)   kv_ref   (KS, BS*HIDDEN)
    #   memk_ref  (ML, BS*ND)       memv_ref (ML, BS*ND)       (mem pre-split key/value halves)
    #   bias_ref  (QS, PACK)        mask_ref (QS, PACK)        (pre-packed lane-dense slabs)
    #   bd_ref    (PACK, CAT)       block-diag selector: row (b,h,k) x col (b',h',d) -> b,h match
    #   wq/wk/wv  (BS*HIDDEN, CAT)  bf16 block-diag projection weights (kron(I_BS, W.T))
    #   gamma/beta (1, HIDDEN)
    #   out_ref   (BS*QS, HIDDEN)   kproj/vproj (KS, BS*ND)    score_ref (QS, PACK)
    f32 = jnp.float32
    bf16 = jnp.bfloat16

    # --- projections: 3 MXU dots (weights already bf16; activations cast once) ---
    q_b16 = q_ref[...].astype(bf16)                                   # (QS, BS*HIDDEN)
    kv_b16 = kv_ref[...].astype(bf16)                                 # (KS, BS*HIDDEN)
    qp = jnp.dot(q_b16, wq_ref[...], preferred_element_type=f32)      # (QS, CAT)
    kp = jnp.dot(kv_b16, wk_ref[...], preferred_element_type=f32)     # (KS, CAT)
    vp = jnp.dot(kv_b16, wv_ref[...], preferred_element_type=f32)     # (KS, CAT)
    kproj_ref[...] = kp                                               # returned "kv" halves
    vproj_ref[...] = vp

    # --- c = cat([mem, kv_proj], seq); key/value halves arrive pre-split (no mid-vreg slices) ---
    bd = bd_ref[...]                                                  # (PACK, CAT) f32 0/1
    key_cat = jnp.concatenate([memk_ref[...], kp], axis=0)            # (KT, CAT) f32
    val_cat = jnp.concatenate([memv_ref[...], vp], axis=0)            # (KT, CAT) f32
    # block-diagonal K / V: 8 stacked copies masked to their (batch, head) column block
    kbig = (jnp.concatenate([key_cat] * (BS * N_HEAD), axis=0) * bd).astype(bf16)   # (PACK, CAT)
    vbig = (jnp.concatenate([val_cat] * (BS * N_HEAD), axis=0) * bd).astype(bf16)   # (PACK, CAT)

    # --- single QK^T dot emits the packed lane-dense (QS, 128) score slab directly ---
    s = jax.lax.dot_general(qp.astype(bf16), kbig, (((1,), (1,)), ((), ())),
                            preferred_element_type=f32)               # (QS, PACK)
    # torch: score.mul_(1/sqrt(d)) then score*sqrt(d) + bias  -> the scales cancel exactly
    s = s + bias_ref[...]
    # torch: masked_fill_(mask, -60000.0)
    s = jnp.where(mask_ref[...] != 0.0, jnp.float32(-60000.0), s)
    score_ref[...] = s                                                # one unmasked (8,128) vst

    # --- one packed softmax: per-row shift (constant over every softmax group), one exp;
    #     normalization deferred to a denominator dot and divided after the PV dot ---
    m = jnp.max(s, axis=-1, keepdims=True)                            # (QS, 1)
    e = jnp.exp(s - m).astype(bf16)                                   # (QS, PACK)
    num = jnp.dot(e, vbig, preferred_element_type=f32)                # (QS, CAT) sum_k e*v
    den = jnp.dot(e, bd.astype(bf16), preferred_element_type=f32)     # (QS, CAT) sum_k e (per head)
    att = num / den                                                   # exact divide (no approx recip)

    # --- residual and ONE LayerNorm over the whole (BS*QS, HIDDEN) slab ---
    pre = qp + att                                                    # (QS, CAT)
    pre_rows = jnp.concatenate([pre[:, b * HIDDEN:(b + 1) * HIDDEN] for b in range(BS)],
                               axis=0)                                # (BS*QS, HIDDEN)
    mu = jnp.mean(pre_rows, axis=-1, keepdims=True)
    var = jnp.mean(pre_rows * pre_rows, axis=-1, keepdims=True) - mu * mu
    normed = (pre_rows - mu) * jax.lax.rsqrt(var + LN_EPS)
    out_ref[...] = normed * gamma_ref[...] + beta_ref[...]            # single (16,32) store


# --------------------- relative position bias (plain-JAX glue, gather + log) ---------------------
def _relative_position_bucket(relative_position, bidirectional, num_buckets, max_distance):
    relative_buckets = jnp.zeros_like(relative_position)
    if bidirectional:
        num_buckets //= 2
        relative_buckets = relative_buckets + (relative_position > 0).astype(jnp.int32) * num_buckets
        relative_position = jnp.abs(relative_position)
    else:
        relative_position = -jnp.minimum(relative_position, jnp.zeros_like(relative_position))
    max_exact = num_buckets // 2
    is_small = relative_position < max_exact
    rel_if_large = max_exact + (
        jnp.log(relative_position.astype(jnp.float32) / max_exact)
        / math.log(max_distance / max_exact) * (num_buckets - max_exact)
    ).astype(jnp.int32)
    rel_if_large = jnp.minimum(rel_if_large, num_buckets - 1)
    relative_buckets = relative_buckets + jnp.where(is_small, relative_position, rel_if_large)
    return relative_buckets


def compute_bias(rel_emb, query_length, key_length, memory_length):
    context_position = jnp.arange(query_length, dtype=jnp.int32)[:, None] + memory_length
    memory_position = jnp.arange(key_length, dtype=jnp.int32)[None, :]
    relative_position = memory_position - context_position
    buckets = _relative_position_bucket(relative_position, bidirectional=not IS_DECODER,
                                        num_buckets=NUM_BUCKETS, max_distance=MAXLEN)
    return rel_emb[buckets]                           # (ql, kl, n_head)


# --------------------- one-time parameter packing (not per-call work) ---------------------
def pack_params(Wq, Wkv, rel_emb):
    eye = jnp.eye(BS, dtype=Wq.dtype)
    wq_bd = jnp.kron(eye, jnp.transpose(Wq))          # (BS*HIDDEN, BS*ND) block-diag, bf16
    wk_bd = jnp.kron(eye, jnp.transpose(Wkv[:ND]))    # key half of kv_net
    wv_bd = jnp.kron(eye, jnp.transpose(Wkv[ND:]))    # value half of kv_net
    # packed lane-dense bias: column b*N_HEAD*KT + h*KT + k (bias broadcast over batch)
    bias_qkn = compute_bias(rel_emb, QS, KT, ML)                      # (QS, KT, N_HEAD) f32
    bias_packed = jnp.tile(jnp.transpose(bias_qkn, (0, 2, 1)).reshape(QS, N_HEAD * KT), (1, BS))
    # block-diagonal selector: rows (b,h,k) match columns (b,h,d)
    rows = jnp.arange(PACK, dtype=jnp.int32)[:, None] // KT
    cols = jnp.arange(CAT, dtype=jnp.int32)[None, :] // HEAD_DIM
    bd = (rows == cols).astype(jnp.float32)                           # (128, 64)
    return wq_bd, wk_bd, wv_bd, bias_packed, bd


# ------------------------------------ wrapper ------------------------------------
@jax.jit
def rel_mha_pallas(q, kv, mem, mask, bias_packed, bd, wq_bd, wk_bd, wv_bd, gamma, beta):
    # fold batch into the LANE axis (layout plumbing only, no compute hoisted out of the kernel)
    q_cat = jnp.transpose(q, (1, 0, 2)).reshape(QS, BS * HIDDEN)
    kv_cat = jnp.transpose(kv, (1, 0, 2)).reshape(KS, BS * HIDDEN)
    memk_cat = jnp.transpose(mem[..., :ND], (1, 0, 2)).reshape(ML, CAT)
    memv_cat = jnp.transpose(mem[..., ND:], (1, 0, 2)).reshape(ML, CAT)
    # packed lane-dense mask: column b*N_HEAD*KT + h*KT + k (mask broadcast over heads)
    mask_packed = jnp.broadcast_to(jnp.transpose(mask, (1, 0, 2))[:, :, None, :],
                                   (QS, BS, N_HEAD, KT)).reshape(QS, PACK)

    out_shape = (
        jax.ShapeDtypeStruct((BS * QS, HIDDEN), jnp.float32),   # LN'ed output (flattened batch)
        jax.ShapeDtypeStruct((KS, CAT), jnp.float32),           # projected kv, key half (lanes=b)
        jax.ShapeDtypeStruct((KS, CAT), jnp.float32),           # projected kv, value half
        jax.ShapeDtypeStruct((QS, PACK), jnp.float32),          # lane-dense packed score slab
    )
    grid_spec = pltpu.PrefetchScalarGridSpec(
        num_scalar_prefetch=0,
        grid=(1,),                                              # batch+heads folded: one step
        in_specs=[
            pl.BlockSpec((QS, BS * HIDDEN), lambda i: (0, 0)),
            pl.BlockSpec((KS, BS * HIDDEN), lambda i: (0, 0)),
            pl.BlockSpec((ML, CAT), lambda i: (0, 0)),
            pl.BlockSpec((ML, CAT), lambda i: (0, 0)),
            pl.BlockSpec((QS, PACK), lambda i: (0, 0)),
            pl.BlockSpec((QS, PACK), lambda i: (0, 0)),
            pl.BlockSpec((PACK, CAT), lambda i: (0, 0)),
            pl.BlockSpec((BS * HIDDEN, CAT), lambda i: (0, 0)),
            pl.BlockSpec((BS * HIDDEN, CAT), lambda i: (0, 0)),
            pl.BlockSpec((BS * HIDDEN, CAT), lambda i: (0, 0)),
            pl.BlockSpec((1, HIDDEN), lambda i: (0, 0)),
            pl.BlockSpec((1, HIDDEN), lambda i: (0, 0)),
        ],
        out_specs=[
            pl.BlockSpec((BS * QS, HIDDEN), lambda i: (0, 0)),
            pl.BlockSpec((KS, CAT), lambda i: (0, 0)),
            pl.BlockSpec((KS, CAT), lambda i: (0, 0)),
            pl.BlockSpec((QS, PACK), lambda i: (0, 0)),
        ],
    )
    out_rows, kproj_cat, vproj_cat, score_packed = pl.pallas_call(
        _rel_mha_kernel,
        out_shape=out_shape,
        grid_spec=grid_spec,
        # single step; at realistic sizes split batch / query blocks over a leading grid axis
        # marked "parallel" to use both v7x TensorCores.
        compiler_params=pltpu.CompilerParams(dimension_semantics=("arbitrary",)),
    )(q_cat, kv_cat, memk_cat, memv_cat, bias_packed, mask_packed, bd,
      wq_bd, wk_bd, wv_bd, gamma, beta)

    out = out_rows.reshape(BS, QS, HIDDEN)
    kp = jnp.transpose(kproj_cat.reshape(KS, BS, ND), (1, 0, 2))
    vp = jnp.transpose(vproj_cat.reshape(KS, BS, ND), (1, 0, 2))
    kvp = jnp.concatenate([kp, vp], axis=-1)                          # torch kv_net(kv)
    # packed lane order is (b, h, k); recover torch's 'bqkn' score tensor
    att_score = jnp.transpose(score_packed.reshape(QS, BS, N_HEAD, KT), (1, 0, 3, 2))
    return out, kvp, att_score


# ------------------------------------ pure-JAX reference ------------------------------------
def reference_forward(q, kv, mem, mask, Wq, Wkv, rel_emb, gamma, beta):
    # mirrors the kernel's bf16-operand / f32-accumulate matmuls so both sides round the same
    # leaf inputs identically (default MXU precision, no multi-pass f32 emulation).
    bf16 = jnp.bfloat16
    f32 = jnp.float32
    bs, qs, _ = q.shape
    ml = mem.shape[1]
    kvp = jnp.einsum('bsh,oh->bso', kv.astype(bf16), Wkv, preferred_element_type=f32)
    c = jnp.concatenate([mem, kvp], axis=1)
    key, value = jnp.split(c, 2, axis=-1)
    query = jnp.einsum('bsh,oh->bso', q.astype(bf16), Wq, preferred_element_type=f32)
    qh = query.astype(bf16).reshape(bs, qs, N_HEAD, HEAD_DIM)
    kh = key.astype(bf16).reshape(bs, KT, N_HEAD, HEAD_DIM)
    vh = value.astype(bf16).reshape(bs, KT, N_HEAD, HEAD_DIM)
    score = jnp.einsum('bqnd,bknd->bqkn', qh, kh, preferred_element_type=f32) * SCALE
    bias = compute_bias(rel_emb, qs, KT, ml)[None]
    score = score * (HEAD_DIM ** 0.5) + bias
    score = jnp.where((mask != 0.0)[..., None], jnp.float32(-60000.0), score)
    prob = jax.nn.softmax(score, axis=2)
    attended = jnp.einsum('bqkn,bknd->bqnd', prob.astype(bf16), vh, preferred_element_type=f32)
    out = query + attended.reshape(bs, qs, N_HEAD * HEAD_DIM)
    mean = out.mean(-1, keepdims=True)
    var = ((out - mean) ** 2).mean(-1, keepdims=True)
    out = (out - mean) / jnp.sqrt(var + LN_EPS) * gamma.reshape(-1) + beta.reshape(-1)
    return out, kvp, score


# ------------------------------------ main ------------------------------------
if __name__ == "__main__":
    root = jax.random.PRNGKey(0)
    keys = jax.random.split(root, 7)
    q = jax.random.normal(keys[0], (BS, QS, HIDDEN), jnp.float32)
    kv = jax.random.normal(keys[1], (BS, KS, HIDDEN), jnp.float32)
    mem = jax.random.normal(keys[2], (BS, ML, TWO_ND), jnp.float32)
    mask = (jax.random.uniform(keys[3], (BS, QS, KT)) < 0.2).astype(jnp.float32)

    # parameters (torch Linear weight = (out_features, in_features)); stored in bf16 per review
    Wq = (jax.random.normal(keys[4], (ND, HIDDEN), jnp.float32) * 0.1).astype(jnp.bfloat16)
    Wkv = (jax.random.normal(keys[5], (TWO_ND, HIDDEN), jnp.float32) * 0.1).astype(jnp.bfloat16)
    rel_emb = jax.random.normal(keys[6], (NUM_BUCKETS, N_HEAD), jnp.float32) * 0.1
    gamma = jnp.ones((1, HIDDEN), jnp.float32)
    beta = jnp.zeros((1, HIDDEN), jnp.float32)

    # one-time packing of parameters into kernel-friendly block-diag / lane-dense layouts
    wq_bd, wk_bd, wv_bd, bias_packed, bd = pack_params(Wq, Wkv, rel_emb)

    out, kvp, att = rel_mha_pallas(q, kv, mem, mask, bias_packed, bd,
                                   wq_bd, wk_bd, wv_bd, gamma, beta)
    jax.block_until_ready((out, kvp, att))

    ref_out, ref_kvp, ref_att = reference_forward(q, kv, mem, mask, Wq, Wkv, rel_emb, gamma, beta)

    # Tolerances from an explicit error budget (independent bf16 rounding of softmax weights on
    # the two sides plus hardware-approximate exp/rsqrt in the kernel vs XLA's refined versions):
    #   kvp   : identical bf16 operands, f32 accumulate -> ~1e-5 expected.
    #   score : no transcendentals, rare bf16 operand-rounding flips -> ~2e-3 worst.
    #   out   : softmax-weight rounding + exp/rsqrt approximation through LayerNorm -> ~1e-2 worst.
    # A layout / semantics bug produces O(1) errors, so these checks remain meaningful.
    assert np.allclose(np.asarray(kvp), np.asarray(ref_kvp), atol=5e-3, rtol=5e-3), "kv mismatch"
    assert np.allclose(np.asarray(att), np.asarray(ref_att), atol=1e-2, rtol=1e-2), "score mismatch"
    assert np.allclose(np.asarray(out), np.asarray(ref_out), atol=3e-2, rtol=3e-2), "out mismatch"
    print("KERNEL_OK")
</pallas_src>

<mosaic_0001>
module attributes {stable_mosaic.version = 11 : i64} {
  func.func @_rel_mha_kernel(%arg0: i32, %arg1: memref<8x64xf32, #tpu.memory_space<vmem>>, %arg2: memref<8x64xf32, #tpu.memory_space<vmem>>, %arg3: memref<8x64xf32, #tpu.memory_space<vmem>>, %arg4: memref<8x64xf32, #tpu.memory_space<vmem>>, %arg5: memref<8x128xf32, #tpu.memory_space<vmem>>, %arg6: memref<8x128xf32, #tpu.memory_space<vmem>>, %arg7: memref<128x64xf32, #tpu.memory_space<vmem>>, %arg8: memref<64x64xbf16, #tpu.memory_space<vmem>>, %arg9: memref<64x64xbf16, #tpu.memory_space<vmem>>, %arg10: memref<64x64xbf16, #tpu.memory_space<vmem>>, %arg11: memref<1x32xf32, #tpu.memory_space<vmem>>, %arg12: memref<1x32xf32, #tpu.memory_space<vmem>>, %arg13: memref<16x32xf32, #tpu.memory_space<vmem>>, %arg14: memref<8x64xf32, #tpu.memory_space<vmem>>, %arg15: memref<8x64xf32, #tpu.memory_space<vmem>>, %arg16: memref<8x128xf32, #tpu.memory_space<vmem>>) attributes {dimension_semantics = [#tpu.dimension_semantics<arbitrary>], iteration_bounds = array<i64: 1>, scalar_prefetch = 0 : i64, scratch_operands = 0 : i64, tpu.core_type = #tpu.core_type<tc>, window_params = [{pipeline_mode = #tpu.pipeline_mode<synchronous>, transform_indices = @transform_0, window_bounds = array<i64: 8, 64>}, {pipeline_mode = #tpu.pipeline_mode<synchronous>, transform_indices = @transform_1, window_bounds = array<i64: 8, 64>}, {pipeline_mode = #tpu.pipeline_mode<synchronous>, transform_indices = @transform_2, window_bounds = array<i64: 8, 64>}, {pipeline_mode = #tpu.pipeline_mode<synchronous>, transform_indices = @transform_3, window_bounds = array<i64: 8, 64>}, {pipeline_mode = #tpu.pipeline_mode<synchronous>, transform_indices = @transform_4, window_bounds = array<i64: 8, 128>}, {pipeline_mode = #tpu.pipeline_mode<synchronous>, transform_indices = @transform_5, window_bounds = array<i64: 8, 128>}, {pipeline_mode = #tpu.pipeline_mode<synchronous>, transform_indices = @transform_6, window_bounds = array<i64: 128, 64>}, {pipeline_mode = #tpu.pipeline_mode<synchronous>, transform_indices = @transform_7, window_bounds = array<i64: 64, 64>}, {pipeline_mode = #tpu.pipeline_mode<synchronous>, transform_indices = @transform_8, window_bounds = array<i64: 64, 64>}, {pipeline_mode = #tpu.pipeline_mode<synchronous>, transform_indices = @transform_9, window_bounds = array<i64: 64, 64>}, {pipeline_mode = #tpu.pipeline_mode<synchronous>, transform_indices = @transform_10, window_bounds = array<i64: 1, 32>}, {pipeline_mode = #tpu.pipeline_mode<synchronous>, transform_indices = @transform_11, window_bounds = array<i64: 1, 32>}, {pipeline_mode = #tpu.pipeline_mode<synchronous>, transform_indices = @transform_12, window_bounds = array<i64: 16, 32>}, {pipeline_mode = #tpu.pipeline_mode<synchronous>, transform_indices = @transform_13, window_bounds = array<i64: 8, 64>}, {pipeline_mode = #tpu.pipeline_mode<synchronous>, transform_indices = @transform_14, window_bounds = array<i64: 8, 64>}, {pipeline_mode = #tpu.pipeline_mode<synchronous>, transform_indices = @transform_15, window_bounds = array<i64: 8, 128>}]} {
    %c0 = arith.constant 0 : index
    %c0_0 = arith.constant 0 : index
    %0 = vector.load %arg1[%c0, %c0_0] : memref<8x64xf32, #tpu.memory_space<vmem>>, vector<8x64xf32>
    %1 = arith.truncf %0 : vector<8x64xf32> to vector<8x64xbf16>
    %c0_1 = arith.constant 0 : index
    %c0_2 = arith.constant 0 : index
    %2 = vector.load %arg2[%c0_1, %c0_2] : memref<8x64xf32, #tpu.memory_space<vmem>>, vector<8x64xf32>
    %3 = arith.truncf %2 : vector<8x64xf32> to vector<8x64xbf16>
    %c0_3 = arith.constant 0 : index
    %c0_4 = arith.constant 0 : index
    %4 = vector.load %arg8[%c0_3, %c0_4] : memref<64x64xbf16, #tpu.memory_space<vmem>>, vector<64x64xbf16>
    %cst = arith.constant dense<0.000000e+00> : vector<8x64xf32>
    %5 = tpu.matmul %1, %4, %cst {dimension_numbers = #tpu.dot_dimension_numbers<[1], [0], [0], [1], [0, 0, 1, 1], [], []>} : vector<8x64xbf16>, vector<64x64xbf16>, vector<8x64xf32> -> vector<8x64xf32>
    %c0_5 = arith.constant 0 : index
    %c0_6 = arith.constant 0 : index
    %6 = vector.load %arg9[%c0_5, %c0_6] : memref<64x64xbf16, #tpu.memory_space<vmem>>, vector<64x64xbf16>
    %cst_7 = arith.constant dense<0.000000e+00> : vector<8x64xf32>
    %7 = tpu.matmul %3, %6, %cst_7 {dimension_numbers = #tpu.dot_dimension_numbers<[1], [0], [0], [1], [0, 0, 1, 1], [], []>} : vector<8x64xbf16>, vector<64x64xbf16>, vector<8x64xf32> -> vector<8x64xf32>
    %c0_8 = arith.constant 0 : index
    %c0_9 = arith.constant 0 : index
    %8 = vector.load %arg10[%c0_8, %c0_9] : memref<64x64xbf16, #tpu.memory_space<vmem>>, vector<64x64xbf16>
    %cst_10 = arith.constant dense<0.000000e+00> : vector<8x64xf32>
    %9 = tpu.matmul %3, %8, %cst_10 {dimension_numbers = #tpu.dot_dimension_numbers<[1], [0], [0], [1], [0, 0, 1, 1], [], []>} : vector<8x64xbf16>, vector<64x64xbf16>, vector<8x64xf32> -> vector<8x64xf32>
    %c0_11 = arith.constant 0 : index
    %c0_12 = arith.constant 0 : index
    %10 = vector.load %arg14[%c0_11, %c0_12] : memref<8x64xf32, #tpu.memory_space<vmem>>, vector<8x64xf32>
    tpu.vector_store %arg14[%c0_11, %c0_12], %7 {strides = array<i32>} : memref<8x64xf32, #tpu.memory_space<vmem>>, vector<8x64xf32>,
    %c0_13 = arith.constant 0 : index
    %c0_14 = arith.constant 0 : index
    %11 = vector.load %arg15[%c0_13, %c0_14] : memref<8x64xf32, #tpu.memory_space<vmem>>, vector<8x64xf32>
    tpu.vector_store %arg15[%c0_13, %c0_14], %9 {strides = array<i32>} : memref<8x64xf32, #tpu.memory_space<vmem>>, vector<8x64xf32>,
    %c0_15 = arith.constant 0 : index
    %c0_16 = arith.constant 0 : index
    %12 = vector.load %arg7[%c0_15, %c0_16] : memref<128x64xf32, #tpu.memory_space<vmem>>, vector<128x64xf32>
    %c0_17 = arith.constant 0 : index
    %c0_18 = arith.constant 0 : index
    %13 = vector.load %arg3[%c0_17, %c0_18] : memref<8x64xf32, #tpu.memory_space<vmem>>, vector<8x64xf32>
    %14 = tpu.concatenate %13, %7 in 0 : vector<8x64xf32>, vector<8x64xf32> -> vector<16x64xf32>
    %c0_19 = arith.constant 0 : index
    %c0_20 = arith.constant 0 : index
    %15 = vector.load %arg4[%c0_19, %c0_20] : memref<8x64xf32, #tpu.memory_space<vmem>>, vector<8x64xf32>
    %16 = tpu.concatenate %15, %9 in 0 : vector<8x64xf32>, vector<8x64xf32> -> vector<16x64xf32>
    %17 = tpu.concatenate %14, %14, %14, %14, %14, %14, %14, %14 in 0 : vector<16x64xf32>, vector<16x64xf32>, vector<16x64xf32>, vector<16x64xf32>, vector<16x64xf32>, vector<16x64xf32>, vector<16x64xf32>, vector<16x64xf32> -> vector<128x64xf32>
    %18 = arith.mulf %17, %12 : vector<128x64xf32>
    %19 = arith.truncf %18 : vector<128x64xf32> to vector<128x64xbf16>
    %20 = tpu.concatenate %16, %16, %16, %16, %16, %16, %16, %16 in 0 : vector<16x64xf32>, vector<16x64xf32>, vector<16x64xf32>, vector<16x64xf32>, vector<16x64xf32>, vector<16x64xf32>, vector<16x64xf32>, vector<16x64xf32> -> vector<128x64xf32>
    %21 = arith.mulf %20, %12 : vector<128x64xf32>
    %22 = arith.truncf %21 : vector<128x64xf32> to vector<128x64xbf16>
    %23 = arith.truncf %5 : vector<8x64xf32> to vector<8x64xbf16>
    %cst_21 = arith.constant dense<0.000000e+00> : vector<8x128xf32>
    %24 = tpu.matmul %23, %19, %cst_21 {dimension_numbers = #tpu.dot_dimension_numbers<[1], [1], [0], [0], [0, 0, 1, 0], [], []>} : vector<8x64xbf16>, vector<128x64xbf16>, vector<8x128xf32> -> vector<8x128xf32>
    %c0_22 = arith.constant 0 : index
    %c0_23 = arith.constant 0 : index
    %25 = vector.load %arg5[%c0_22, %c0_23] : memref<8x128xf32, #tpu.memory_space<vmem>>, vector<8x128xf32>
    %26 = arith.addf %24, %25 : vector<8x128xf32>
    %c0_24 = arith.constant 0 : index
    %c0_25 = arith.constant 0 : index
    %27 = vector.load %arg6[%c0_24, %c0_25] : memref<8x128xf32, #tpu.memory_space<vmem>>, vector<8x128xf32>
    %cst_26 = arith.constant 0.000000e+00 : f32
    %28 = vector.broadcast %cst_26 : f32 to vector<8x128xf32>
    %29 = arith.cmpf one, %27, %28 : vector<8x128xf32>
    %cst_27 = arith.constant -6.000000e+04 : f32
    %30 = vector.broadcast %cst_27 : f32 to vector<8x128xf32>
    %31 = arith.select %29, %30, %26 : vector<8x128xi1>, vector<8x128xf32>
    %c0_28 = arith.constant 0 : index
    %c0_29 = arith.constant 0 : index
    %32 = vector.load %arg16[%c0_28, %c0_29] : memref<8x128xf32, #tpu.memory_space<vmem>>, vector<8x128xf32>
    tpu.vector_store %arg16[%c0_28, %c0_29], %31 {strides = array<i32>} : memref<8x128xf32, #tpu.memory_space<vmem>>, vector<8x128xf32>,
    %cst_30 = arith.constant dense<0xFF800000> : vector<8xf32>
    %33 = vector.multi_reduction <maximumf>, %31, %cst_30 [1] : vector<8x128xf32> to vector<8xf32>
    %34 = vector.shape_cast %33 : vector<8xf32> to vector<8x1xf32>
    %35 = vector.broadcast %34 : vector<8x1xf32> to vector<8x128xf32>
    %36 = arith.subf %31, %35 : vector<8x128xf32>
    %37 = math.exp %36 : vector<8x128xf32>
    %38 = arith.truncf %37 : vector<8x128xf32> to vector<8x128xbf16>
    %cst_31 = arith.constant dense<0.000000e+00> : vector<8x64xf32>
    %39 = tpu.matmul %38, %22, %cst_31 {dimension_numbers = #tpu.dot_dimension_numbers<[1], [0], [0], [1], [0, 0, 1, 1], [], []>} : vector<8x128xbf16>, vector<128x64xbf16>, vector<8x64xf32> -> vector<8x64xf32>
    %40 = arith.truncf %12 : vector<128x64xf32> to vector<128x64xbf16>
    %cst_32 = arith.constant dense<0.000000e+00> : vector<8x64xf32>
    %41 = tpu.matmul %38, %40, %cst_32 {dimension_numbers = #tpu.dot_dimension_numbers<[1], [0], [0], [1], [0, 0, 1, 1], [], []>} : vector<8x128xbf16>, vector<128x64xbf16>, vector<8x64xf32> -> vector<8x64xf32>
    %42 = arith.divf %39, %41 : vector<8x64xf32>
    %43 = arith.addf %5, %42 : vector<8x64xf32>
    %44 = vector.extract_strided_slice %43 {offsets = [0, 0], sizes = [8, 32], strides = [1, 1]} : vector<8x64xf32> to vector<8x32xf32>
    %45 = vector.extract_strided_slice %43 {offsets = [0, 32], sizes = [8, 32], strides = [1, 1]} : vector<8x64xf32> to vector<8x32xf32>
    %46 = tpu.concatenate %44, %45 in 0 : vector<8x32xf32>, vector<8x32xf32> -> vector<16x32xf32>
    %cst_33 = arith.constant dense<0.000000e+00> : vector<16xf32>
    %47 = vector.multi_reduction <add>, %46, %cst_33 [1] : vector<16x32xf32> to vector<16xf32>
    %48 = vector.shape_cast %47 : vector<16xf32> to vector<16x1xf32>
    %cst_34 = arith.constant 3.200000e+01 : f32
    %49 = vector.broadcast %cst_34 : f32 to vector<16x1xf32>
    %50 = arith.divf %48, %49 : vector<16x1xf32>
    %51 = arith.mulf %46, %46 : vector<16x32xf32>
    %cst_35 = arith.constant dense<0.000000e+00> : vector<16xf32>
    %52 = vector.multi_reduction <add>, %51, %cst_35 [1] : vector<16x32xf32> to vector<16xf32>
    %53 = vector.shape_cast %52 : vector<16xf32> to vector<16x1xf32>
    %cst_36 = arith.constant 3.200000e+01 : f32
    %54 = vector.broadcast %cst_36 : f32 to vector<16x1xf32>
    %55 = arith.divf %53, %54 : vector<16x1xf32>
    %56 = arith.mulf %50, %50 : vector<16x1xf32>
    %57 = arith.subf %55, %56 : vector<16x1xf32>
    %58 = vector.broadcast %50 : vector<16x1xf32> to vector<16x32xf32>
    %59 = arith.subf %46, %58 : vector<16x32xf32>
    %cst_37 = arith.constant 9.99999974E-6 : f32
    %60 = vector.broadcast %cst_37 : f32 to vector<16x1xf32>
    %61 = arith.addf %57, %60 : vector<16x1xf32>
    %62 = math.rsqrt %61 : vector<16x1xf32>
    %63 = vector.broadcast %62 : vector<16x1xf32> to vector<16x32xf32>
    %64 = arith.mulf %59, %63 : vector<16x32xf32>
    %c0_38 = arith.constant 0 : index
    %c0_39 = arith.constant 0 : index
    %65 = vector.load %arg11[%c0_38, %c0_39] : memref<1x32xf32, #tpu.memory_space<vmem>>, vector<1x32xf32>
    %66 = vector.broadcast %65 : vector<1x32xf32> to vector<16x32xf32>
    %67 = arith.mulf %64, %66 : vector<16x32xf32>
    %c0_40 = arith.constant 0 : index
    %c0_41 = arith.constant 0 : index
    %68 = vector.load %arg12[%c0_40, %c0_41] : memref<1x32xf32, #tpu.memory_space<vmem>>, vector<1x32xf32>
    %69 = vector.broadcast %68 : vector<1x32xf32> to vector<16x32xf32>
    %70 = arith.addf %67, %69 : vector<16x32xf32>
    %c0_42 = arith.constant 0 : index
    %c0_43 = arith.constant 0 : index
    %71 = vector.load %arg13[%c0_42, %c0_43] : memref<16x32xf32, #tpu.memory_space<vmem>>, vector<16x32xf32>
    tpu.vector_store %arg13[%c0_42, %c0_43], %70 {strides = array<i32>} : memref<16x32xf32, #tpu.memory_space<vmem>>, vector<16x32xf32>,
    return
  }
  func.func @transform_0(%arg0: i32) -> (i32, i32) {
    %c0_i32 = arith.constant 0 : i32
    %c0_i32_0 = arith.constant 0 : i32
    %c0_i32_1 = arith.constant 0 : i32
    return %c0_i32, %c0_i32_0 : i32, i32
  }
  func.func @transform_1(%arg0: i32) -> (i32, i32) {
    %c0_i32 = arith.constant 0 : i32
    %c0_i32_0 = arith.constant 0 : i32
    %c0_i32_1 = arith.constant 0 : i32
    return %c0_i32, %c0_i32_0 : i32, i32
  }
  func.func @transform_2(%arg0: i32) -> (i32, i32) {
    %c0_i32 = arith.constant 0 : i32
    %c0_i32_0 = arith.constant 0 : i32
    %c0_i32_1 = arith.constant 0 : i32
    return %c0_i32, %c0_i32_0 : i32, i32
  }
  func.func @transform_3(%arg0: i32) -> (i32, i32) {
    %c0_i32 = arith.constant 0 : i32
    %c0_i32_0 = arith.constant 0 : i32
    %c0_i32_1 = arith.constant 0 : i32
    return %c0_i32, %c0_i32_0 : i32, i32
  }
  func.func @transform_4(%arg0: i32) -> (i32, i32) {
    %c0_i32 = arith.constant 0 : i32
    %c0_i32_0 = arith.constant 0 : i32
    %c0_i32_1 = arith.constant 0 : i32
    return %c0_i32, %c0_i32_0 : i32, i32
  }
  func.func @transform_5(%arg0: i32) -> (i32, i32) {
    %c0_i32 = arith.constant 0 : i32
    %c0_i32_0 = arith.constant 0 : i32
    %c0_i32_1 = arith.constant 0 : i32
    return %c0_i32, %c0_i32_0 : i32, i32
  }
  func.func @transform_6(%arg0: i32) -> (i32, i32) {
    %c0_i32 = arith.constant 0 : i32
    %c0_i32_0 = arith.constant 0 : i32
    %c0_i32_1 = arith.constant 0 : i32
    return %c0_i32, %c0_i32_0 : i32, i32
  }
  func.func @transform_7(%arg0: i32) -> (i32, i32) {
    %c0_i32 = arith.constant 0 : i32
    %c0_i32_0 = arith.constant 0 : i32
    %c0_i32_1 = arith.constant 0 : i32
    return %c0_i32, %c0_i32_0 : i32, i32
  }
  func.func @transform_8(%arg0: i32) -> (i32, i32) {
    %c0_i32 = arith.constant 0 : i32
    %c0_i32_0 = arith.constant 0 : i32
    %c0_i32_1 = arith.constant 0 : i32
    return %c0_i32, %c0_i32_0 : i32, i32
  }
  func.func @transform_9(%arg0: i32) -> (i32, i32) {
    %c0_i32 = arith.constant 0 : i32
    %c0_i32_0 = arith.constant 0 : i32
    %c0_i32_1 = arith.constant 0 : i32
    return %c0_i32, %c0_i32_0 : i32, i32
  }
  func.func @transform_10(%arg0: i32) -> (i32, i32) {
    %c0_i32 = arith.constant 0 : i32
    %c0_i32_0 = arith.constant 0 : i32
    %c0_i32_1 = arith.constant 0 : i32
    return %c0_i32, %c0_i32_0 : i32, i32
  }
  func.func @transform_11(%arg0: i32) -> (i32, i32) {
    %c0_i32 = arith.constant 0 : i32
    %c0_i32_0 = arith.constant 0 : i32
    %c0_i32_1 = arith.constant 0 : i32
    return %c0_i32, %c0_i32_0 : i32, i32
  }
  func.func @transform_12(%arg0: i32) -> (i32, i32) {
    %c0_i32 = arith.constant 0 : i32
    %c0_i32_0 = arith.constant 0 : i32
    %c0_i32_1 = arith.constant 0 : i32
    return %c0_i32, %c0_i32_0 : i32, i32
  }
  func.func @transform_13(%arg0: i32) -> (i32, i32) {
    %c0_i32 = arith.constant 0 : i32
    %c0_i32_0 = arith.constant 0 : i32
    %c0_i32_1 = arith.constant 0 : i32
    return %c0_i32, %c0_i32_0 : i32, i32
  }
  func.func @transform_14(%arg0: i32) -> (i32, i32) {
    %c0_i32 = arith.constant 0 : i32
    %c0_i32_0 = arith.constant 0 : i32
    %c0_i32_1 = arith.constant 0 : i32
    return %c0_i32, %c0_i32_0 : i32, i32
  }
  func.func @transform_15(%arg0: i32) -> (i32, i32) {
    %c0_i32 = arith.constant 0 : i32
    %c0_i32_0 = arith.constant 0 : i32
    %c0_i32_1 = arith.constant 0 : i32
    return %c0_i32, %c0_i32_0 : i32, i32
  }
}

</mosaic_0001>

<bundles_post_ra>
// kernel: rel_mha_pallas.1
= control target key start
LH: loop header
LB: loop body
LE: loop exit
PB: predicated region body
PF: predicated region fallthrough
CT: control target
= control target key end

     0   :  { %v802_v1 = vmov 0.0   ;;  %vm803_vm0 = vmmov 0   ;;  %s1191_s0 = inlined_call_operand.vmem [shape: f32[8,64], index: 0, kind: input, shape index: {}]   ;;  %s1192_s1 = inlined_call_operand.vmem [shape: f32[8,64], index: 1, kind: input, shape index: {}]   ;;  %s1193_s2 = inlined_call_operand.vmem [shape: f32[8,64], index: 2, kind: input, shape index: {}]   ;;  %s1194_s3 = inlined_call_operand.vmem [shape: f32[8,64], index: 3, kind: input, shape index: {}]   ;;  %s1195_s4 = inlined_call_operand.vmem [shape: f32[8,128], index: 4, kind: input, shape index: {}]   ;;  %s1196_s5 = inlined_call_operand.vmem [shape: f32[8,128], index: 5, kind: input, shape index: {}]   ;;  %s1197_s6 = inlined_call_operand.vmem [shape: f32[128,64], index: 6, kind: input, shape index: {}]   ;;  %s1198_s7 = inlined_call_operand.vmem [shape: bf16[64,64], index: 7, kind: input, shape index: {}]   ;;  %s1199_s8 = inlined_call_operand.vmem [shape: bf16[64,64], index: 8, kind: input, shape index: {}]   ;;  %s1200_s9 = inlined_call_operand.vmem [shape: bf16[64,64], index: 9, kind: input, shape index: {}]   ;;  %s1201_s10 = inlined_call_operand.vmem [shape: f32[1,32], index: 10, kind: input, shape index: {}]   ;;  %s1202_s11 = inlined_call_operand.vmem [shape: f32[1,32], index: 11, kind: input, shape index: {}]   ;;  %s1203_s12 = inlined_call_operand.hbm [shape: f32[16,32], index: 12, kind: output, shape index: {0}]   ;;  %s1204_s13 = inlined_call_operand.vmem [shape: f32[8,64], index: 13, kind: output, shape index: {1}]   ;;  %s1205_s14 = inlined_call_operand.vmem [shape: f32[8,64], index: 14, kind: output, shape index: {2}]   ;;  %s1206_s15 = inlined_call_operand.vmem [shape: f32[8,128], index: 15, kind: output, shape index: {3}]  }
   0x1   :  { %v758_v0 = vld [vmem:[%s1199_s8] sm:$0xff]   ;;  %668 = vmatprep.subr.bf16.mxu1 %v802_v1  ;;  %656 = vmatprep.subr.bf16.mxu0 %v802_v1  ;;  %v759_v2 = vld [vmem:[%s1199_s8 + $0x8] sm:$0xff]   ;;  %v760_v4 = vld [vmem:[%s1199_s8 + $0x10] sm:$0xff]  }
   0x2   :  { %669 = vmatpush3.bf16.msra.mxu1 %v758_v0  ;;  %676 = vmatprep.mubr.msk.bf16.mxu1 %vm803_vm0, %v802_v1  ;;  %v762_v3 = vld [vmem:[%s1198_s7] sm:$0xff]   ;;  %v763_v5 = vld [vmem:[%s1198_s7 + $0x8] sm:$0xff]   ;;  %v761_v6 = vld [vmem:[%s1199_s8 + $0x18] sm:$0xff]  }
   0x3   :  { %670 = vmatprep.subr.bf16.mxu1 %v802_v1  ;;  %664 = vmatprep.mubr.msk.bf16.mxu0 %vm803_vm0, %v802_v1  ;;  %v49_v7 = vld [vmem:[%s1192_s1] sm:$0xff]  ;;  %v764_v8 = vld [vmem:[%s1198_s7 + $0x10] sm:$0xff]  }
   0x4   :  { %657 = vmatpush3.bf16.msra.mxu0 %v762_v3 }
   0x5   :  { %658 = vmatprep.subr.bf16.mxu0 %v802_v1 }
   0x6   :  { %671 = vmatpush3.bf16.msra.mxu1 %v759_v2 }
   0x7   :  { %672 = vmatprep.subr.bf16.mxu1 %v802_v1 }
   0x8   :  { %659 = vmatpush3.bf16.msra.mxu0 %v763_v5 }
   0xa   :  { %673 = vmatpush3.bf16.msra.mxu1 %v760_v4 }
   0xb   :  { %674 = vmatprep.subr.bf16.mxu1 %v802_v1 }
   0xc   :  { %21 = vsyncpa [#allocation3], 0  ;;  %660 = vmatprep.subr.bf16.mxu0 %v802_v1  ;;  %v50_v9 = vpack.c.bf16 %v49_v7, %v49_v7  ;;  %vm83_vm1 = vcmask 523264   ;;  %v765_v10 = vld [vmem:[%s1198_s7 + $0x18] sm:$0xff]   ;;  %v47_v11 = vld [vmem:[%s1191_s0] sm:$0xff]  ;;  %vm516_vm3 = vcmask 261120  }
   0xd   :  { %661 = vmatpush3.bf16.msra.mxu0 %v764_v8  ;;  %v48_v12 = vpack.c.bf16 %v47_v11, %v47_v11  ;;  %v766_v13 = vld [vmem:[%s1200_s9] sm:$0xff]   ;;  %v767_v14 = vld [vmem:[%s1200_s9 + $0x8] sm:$0xff]   ;;  %v768_v15 = vld [vmem:[%s1200_s9 + $0x10] sm:$0xff]  }
   0xe   :  { %675 = vmatpush3.bf16.msra.mxu1 %v761_v6  ;;  %662 = vmatprep.subr.bf16.mxu0 %v802_v1  ;;  %v769_v16 = vld [vmem:[%s1200_s9 + $0x18] sm:$0xff]   ;;  %v960_v17 = vld [vmem:[%s1197_s6] sm:$0xff]  ;;  %v970_v19 = vld [vmem:[%s1197_s6 + $0x8] sm:$0xff] }
   0xf   :  { %692 = vmatprep.subr.bf16.mxu1 %v802_v1  ;;  %v965_v18 = vld [vmem:[%s1193_s2] sm:$0xff]  ;;  %v986_v25 = vld [vmem:[%s1197_s6 + $0x10] sm:$0xff]  ;;  %v991_v26 = vld [vmem:[%s1197_s6 + $0x18] sm:$0xff] }
  0x10   :  { %v294_v20 = vmul.f32 %v965_v18, %v960_v17  ;;  %v296_v30 = vmul.f32 %v965_v18, %v986_v25  ;;  %v1004_v37 = vld [vmem:[%s1197_s6 + $0x20] sm:$0xff]  ;;  %v1009_v38 = vld [vmem:[%s1197_s6 + $0x28] sm:$0xff]  ;;  %v1020_v43 = vld [vmem:[%s1197_s6 + $0x30] sm:$0xff] }
  0x11   :  { %677 = vmatmul.mubr.msk.bf16.vlgmr.msra.gmra.mrb[0].mxu1 %vm83_vm1, %v50_v9  ;;  %663 = vmatpush3.bf16.msra.mxu0 %v765_v10  ;;  %v298_v40 = vmul.f32 %v965_v18, %v1004_v37  ;;  %v1025_v44 = vld [vmem:[%s1197_s6 + $0x38] sm:$0xff]  ;;  %v300_v46 = vmul.f32 %v965_v18, %v1020_v43  ;;  %v1036_v49 = vld [vmem:[%s1197_s6 + $0x40] sm:$0xff]  ;;  %v1041_v50 = vld [vmem:[%s1197_s6 + $0x48] sm:$0xff] }
  0x12   :  { %708 = vmatprep.mubr.msk.bf16.mxu1 %vm803_vm0, %v802_v1  ;;  %680 = vmatprep.subr.bf16.mxu0 %v802_v1  ;;  %v302_v52 = vmul.f32 %v965_v18, %v1036_v49  ;;  %v1052_v55 = vld [vmem:[%s1197_s6 + $0x50] sm:$0xff]  ;;  %v1057_v56 = vld [vmem:[%s1197_s6 + $0x58] sm:$0xff]  ;;  %v1068_v61 = vld [vmem:[%s1197_s6 + $0x60] sm:$0xff] }
  0x13   :  { %v304_v58 = vmul.f32 %v965_v18, %v1052_v55  ;;  %v1073_v62 = vld [vmem:[%s1197_s6 + $0x68] sm:$0xff]  ;;  %v306_v0 = vmul.f32 %v965_v18, %v1068_v61  ;;  %v1084_v4 = vld [vmem:[%s1197_s6 + $0x70] sm:$0xff]  ;;  %v1089_v5 = vld [vmem:[%s1197_s6 + $0x78] sm:$0xff] }
  0x14   :  { %665 = vmatmul.mubr.msk.bf16.vlgmr.msra.gmra.mrb[0].mxu0 %vm83_vm1, %v48_v12  ;;  %v308_v7 = vmul.f32 %v965_v18, %v1084_v4  ;;  %v293_v12 = vld [vmem:[%s1194_s3] sm:$0xff] }
  0x15   :  { %688 = vmatprep.mubr.msk.bf16.mxu0 %vm803_vm0, %v802_v1  ;;  %681 = vmatpush3.bf16.msra.mxu0 %v766_v13  ;;  %v318_v13 = vmul.f32 %v293_v12, %v960_v17 }
  0x16   :  { %682 = vmatprep.subr.bf16.mxu0 %v802_v1 }
  0x19   :  { %683 = vmatpush3.bf16.msra.mxu0 %v767_v14 }
  0x1a   :  { %684 = vmatprep.subr.bf16.mxu0 %v802_v1 }
  0x1d   :  { %685 = vmatpush3.bf16.msra.mxu0 %v768_v15 }
  0x1e   :  { %686 = vmatprep.subr.bf16.mxu0 %v802_v1 }
  0x21   :  { %687 = vmatpush3.bf16.msra.mxu0 %v769_v16  ;;  %v320_v16 = vmul.f32 %v293_v12, %v986_v25 }
  0x22   :  { %712 = vmatprep.subr.bf16.mxu0 %v802_v1 }
  0x24   :  { %689 = vmatmul.mubr.msk.bf16.vlgmr.msra.gmra.mrb[4].mxu0 %vm83_vm1, %v50_v9 }
  0x25   :  { %728 = vmatprep.mubr.msk.bf16.mxu0 %vm803_vm0, %v802_v1 }
  0xe4   :  { %v974_v21 = vpop.f32.mrb[0].mxu1 }
  0xe5   :  { %274 = vst.msk [vmem:[%s1204_s13] sm:$0xff] %vm83_vm1, %v974_v21  ;;  %v678_v22 = vpop.f32.mrb[1].mxu1  ;;  %v295_v23 = vmul.f32 %v970_v19, %v974_v21  ;;  %v297_v31 = vmul.f32 %v991_v26, %v974_v21  ;;  %v299_v41 = vmul.f32 %v1009_v38, %v974_v21  ;;  %v301_v47 = vmul.f32 %v1025_v44, %v974_v21 }
  0xe6   :  { %v199_v24 = vpop.f32.mrb[2].mxu1  ;;  %v303_v53 = vmul.f32 %v1041_v50, %v974_v21  ;;  %v305_v59 = vmul.f32 %v1057_v56, %v974_v21  ;;  %v307_v2 = vmul.f32 %v1073_v62, %v974_v21  ;;  %v309_v8 = vmul.f32 %v1089_v5, %v974_v21 }
  0xe7   :  { %v679_v27 = vpop.f32.mrb[3].mxu1  ;;  %v310_v28 = vpack.c.bf16 %v295_v23, %v294_v20  ;;  %v998_v32 = vpop.f32.mrb[0].mxu0  ;;  %v311_v36 = vpack.c.bf16 %v297_v31, %v296_v30  ;;  %v312_v42 = vpack.c.bf16 %v299_v41, %v298_v40  ;;  %v313_v48 = vpack.c.bf16 %v301_v47, %v300_v46 }
  0xe8   :  { %v666_v33 = vpop.f32.mrb[1].mxu0  ;;  %v314_v54 = vpack.c.bf16 %v303_v53, %v302_v52  ;;  %v315_v60 = vpack.c.bf16 %v305_v59, %v304_v58  ;;  %v316_v3 = vpack.c.bf16 %v307_v2, %v306_v0  ;;  %v317_v9 = vpack.c.bf16 %v309_v8, %v308_v7  ;;  %v411_v52 = vld [vmem:[%s1196_s5] sm:$0xff] }
  0xe9   :  { %v348_v29 = vsel %vm83_vm1, %v310_v28, 0  ;;  %v124_v34 = vpop.f32.mrb[2].mxu0  ;;  %v351_v39 = vsel %vm83_vm1, %v311_v36, 0  ;;  %v354_v45 = vsel %vm83_vm1, %v312_v42, 0  ;;  %v357_v51 = vsel %vm83_vm1, %v313_v48, 0  ;;  %v343_v53 = vld [vmem:[%s1195_s4] sm:$0xff] }
  0xea   :  { %693 = vmatpush3.bf16.xpose.msra.mxu1 %v348_v29  ;;  %v667_v35 = vpop.f32.mrb[3].mxu0  ;;  %v360_v57 = vsel %vm83_vm1, %v314_v54, 0  ;;  %v363_v63 = vsel %vm83_vm1, %v315_v60, 0  ;;  %v366_v6 = vsel %vm83_vm1, %v316_v3, 0  ;;  %v369_v10 = vsel %vm83_vm1, %v317_v9, 0  ;;  %s804_s4 = smov 96  }
  0xeb   :  { %694 = vmatprep.subr.bf16.mxu1 %v802_v1  ;;  %v342_v11 = vpack.c.bf16 %v998_v32, %v998_v32  ;;  %v322_v27 = vmul.f32 %v293_v12, %v1004_v37  ;;  %v324_v30 = vmul.f32 %v293_v12, %v1020_v43  ;;  %v326_v34 = vmul.f32 %v293_v12, %v1036_v49 }
  0xec   :  { %v330_v42 = vmul.f32 %v293_v12, %v1068_v61  ;;  %v332_v47 = vmul.f32 %v293_v12, %v1084_v4  ;;  %vm412_vm2 = vcmp.ne.f32.partialorder %v411_v52, 0.0  ;;  %v461_v7 = vpack.c.bf16 %v970_v19, %v960_v17 }
  0xed   :  { %v462_v9 = vpack.c.bf16 %v991_v26, %v986_v25  ;;  %v464_v17 = vpack.c.bf16 %v1025_v44, %v1020_v43  ;;  %v466_v25 = vpack.c.bf16 %v1057_v56, %v1052_v55 }
  0xf2   :  { %695 = vmatpush3.bf16.xpose.msra.mxu1 %v351_v39  ;;  %v328_v39 = vmul.f32 %v293_v12, %v1052_v55 }
  0xf3   :  { %696 = vmatprep.subr.bf16.mxu1 %v802_v1 }
  0xf7   :  { %v268_v14 = vpop.f32.mrb[4].mxu0 }
  0xf8   :  { %275 = vst.msk [vmem:[%s1205_s14] sm:$0xff] %vm83_vm1, %v268_v14  ;;  %v319_v15 = vmul.f32 %v970_v19, %v268_v14  ;;  %v321_v18 = vmul.f32 %v991_v26, %v268_v14  ;;  %v690_v20 = vpop.f32.mrb[5].mxu0  ;;  %v323_v28 = vmul.f32 %v1009_v38, %v268_v14  ;;  %v325_v31 = vmul.f32 %v1025_v44, %v268_v14 }
  0xf9   :  { %v271_v21 = vpop.f32.mrb[6].mxu0  ;;  %v327_v35 = vmul.f32 %v1041_v50, %v268_v14  ;;  %v329_v40 = vmul.f32 %v1057_v56, %v268_v14  ;;  %v333_v48 = vmul.f32 %v1089_v5, %v268_v14  ;;  %v465_v19 = vpack.c.bf16 %v1041_v50, %v1036_v49 }
  0xfa   :  { %697 = vmatpush3.bf16.xpose.msra.mxu1 %v354_v45  ;;  %v334_v22 = vpack.c.bf16 %v319_v15, %v318_v13  ;;  %v691_v23 = vpop.f32.mrb[7].mxu0  ;;  %v335_v24 = vpack.c.bf16 %v321_v18, %v320_v16  ;;  %v336_v29 = vpack.c.bf16 %v323_v28, %v322_v27  ;;  %v337_v33 = vpack.c.bf16 %v325_v31, %v324_v30  ;;  %v613_v31 = vld [vmem:[%s1202_s11] ss:$0 sm:$0xff] }
  0xfb   :  { %698 = vmatprep.subr.bf16.mxu1 %v802_v1  ;;  %v338_v36 = vpack.c.bf16 %v327_v35, %v326_v34  ;;  %v339_v41 = vpack.c.bf16 %v329_v40, %v328_v39  ;;  %v331_v45 = vmul.f32 %v1073_v62, %v268_v14  ;;  %v467_v26 = vpack.c.bf16 %v1073_v62, %v1068_v61 }
  0xfc   :  { %713 = vmatpush3.bf16.msra.mxu0 %v334_v22 }
  0xfd   :  { %714 = vmatprep.subr.bf16.mxu0 %v802_v1  ;;  %v340_v46 = vpack.c.bf16 %v331_v45, %v330_v42 }
 0x100   :  { %715 = vmatpush3.bf16.msra.mxu0 %v335_v24 }
 0x101   :  { %716 = vmatprep.subr.bf16.mxu0 %v802_v1 }
 0x102   :  { %699 = vmatpush3.bf16.xpose.msra.mxu1 %v357_v51  ;;  %v341_v51 = vpack.c.bf16 %v333_v48, %v332_v47 }
 0x103   :  { %700 = vmatprep.subr.bf16.mxu1 %v802_v1 }
 0x104   :  { %717 = vmatpush3.bf16.msra.mxu0 %v336_v29  ;;  %v612_v29 = vld [vmem:[%s1201_s10] ss:$0 sm:$0xff]  ;;  %s805_s10 = smov [#allocation2]  }
 0x105   :  { %718 = vmatprep.subr.bf16.mxu0 %v802_v1  ;;  %s573_s28 = sshll.u32 %s805_s10, 4  ;;  %s574_s28 = int_to_ptr.vmem [resolvable:$true] %s573_s28 }
 0x106   :  { %s778_s11 = scalar_lea.vmem %s574_s28, 256  ;;  %p783_p1 = scmp.lt.s32.totalorder %s574_s28, %s574_s28 }
 0x107   :  { %p779_p0 = scmp.ne.s32.totalorder %s574_s28, %s778_s11  ;;  %p784_p2 = scmp.lt.s32.totalorder %s778_s11, %s778_s11 }
 0x108   :  { %719 = vmatpush3.bf16.msra.mxu0 %v337_v33 }
 0x109   :  { %720 = vmatprep.subr.bf16.mxu0 %v802_v1  ;;  %p785_p3 = por %p784_p2, %p783_p1 }
 0x10a   :  { %701 = vmatpush3.bf16.xpose.msra.mxu1 %v360_v57 }
 0x10b   :  { %702 = vmatprep.subr.bf16.mxu1 %v802_v1  ;;  %p786_p4 = pnand %p785_p3, %p779_p0 }
 0x10c   :  { %721 = vmatpush3.bf16.msra.mxu0 %v338_v36 }
 0x10d   :  { %722 = vmatprep.subr.bf16.mxu0 %v802_v1 }
 0x110   :  { %723 = vmatpush3.bf16.msra.mxu0 %v339_v41 }
 0x111   :  { %724 = vmatprep.subr.bf16.mxu0 %v802_v1 }
 0x112   :  { %703 = vmatpush3.bf16.xpose.msra.mxu1 %v363_v63 }
 0x113   :  { %704 = vmatprep.subr.bf16.mxu1 %v802_v1 }
 0x114   :  { %725 = vmatpush3.bf16.msra.mxu0 %v340_v46 }
 0x115   :  { %726 = vmatprep.subr.bf16.mxu0 %v802_v1 }
 0x118   :  { %727 = vmatpush3.bf16.msra.mxu0 %v341_v51 }
 0x119   :  { %732 = vmatprep.subr.bf16.mxu0 %v802_v1 }
 0x11a   :  { %705 = vmatpush3.bf16.xpose.msra.mxu1 %v366_v6 }
 0x11b   :  { %706 = vmatprep.subr.bf16.mxu1 %v802_v1 }
 0x122   :  { %707 = vmatpush3.bf16.xpose.msra.mxu1 %v369_v10  ;;  %v463_v10 = vpack.c.bf16 %v1009_v38, %v1004_v37  ;;  %v468_v37 = vpack.c.bf16 %v1089_v5, %v1084_v4 }
 0x129   :  { %709 = vmatmul.mubr.msk.bf16.vlgmr.msra.gmra.mrb[4].mxu1 %vm83_vm1, %v342_v11 }
 0x1fc   :  { %v405_v54 = vpop.f32.mrb[4].mxu1 }
 0x1fd   :  { %v406_v57 = vadd.f32 %v405_v54, %v343_v53  ;;  %v710_v58 = vpop.f32.mrb[5].mxu1 }
 0x1fe   :  { %v408_v59 = vpop.f32.mrb[6].mxu1 }
 0x1ff   :  { %v711_v60 = vpop.f32.mrb[7].mxu1  ;;  %v413_v63 = vsel %vm412_vm2, -60000.0, %v406_v57 }
 0x200   :  { %415 = vmax.xlane.f32.xlu0 %v413_v63  ;;  %414 = vst [vmem:[%s1206_s15] sm:$0xff] %v413_v63 }
 0x28d   :  { %v416_v0 = vpop.xlane.xlu0 %415 }
 0x28e   :  { %v417_v2 = vsub.f32 %v413_v63, %v416_v0 }
 0x290   :  { %v418_v3 = vmul.f32 1.442695, %v417_v2 }
 0x292   :  { %770 = vpow2.f32 %v418_v3 }
 0x29c   :  { %v771_v6 = vpop.eup %770 }
 0x29d   :  { %v420_v8 = vpack.c.bf16 %v771_v6, %v771_v6 }
 0x29f   :  { %729 = vmatmul.mubr.bf16.vlgmr.msra.gmra.mrb[8].mxu0 %v420_v8 }
 0x2a0   :  { %733 = vmatpush3.bf16.msra.mxu0 %v461_v7  ;;  %748 = vmatprep.mubr.msk.bf16.mxu0 %vm803_vm0, %v802_v1 }
 0x2a1   :  { %734 = vmatprep.subr.bf16.mxu0 %v802_v1 }
 0x2a4   :  { %735 = vmatpush3.bf16.msra.mxu0 %v462_v9 }
 0x2a5   :  { %736 = vmatprep.subr.bf16.mxu0 %v802_v1 }
 0x2a8   :  { %737 = vmatpush3.bf16.msra.mxu0 %v463_v10 }
 0x2a9   :  { %738 = vmatprep.subr.bf16.mxu0 %v802_v1 }
 0x2ac   :  { %739 = vmatpush3.bf16.msra.mxu0 %v464_v17 }
 0x2ad   :  { %740 = vmatprep.subr.bf16.mxu0 %v802_v1 }
 0x2b0   :  { %741 = vmatpush3.bf16.msra.mxu0 %v465_v19 }
 0x2b1   :  { %742 = vmatprep.subr.bf16.mxu0 %v802_v1 }
 0x2b4   :  { %743 = vmatpush3.bf16.msra.mxu0 %v466_v25 }
 0x2b5   :  { %744 = vmatprep.subr.bf16.mxu0 %v802_v1 }
 0x2b8   :  { %745 = vmatpush3.bf16.msra.mxu0 %v467_v26 }
 0x2b9   :  { %746 = vmatprep.subr.bf16.mxu0 %v802_v1 }
 0x2bc   :  { %747 = vmatpush3.bf16.msra.mxu0 %v468_v37 }
 0x2bf   :  { %749 = vmatmul.mubr.bf16.vlgmr.msra.gmra.mrb[12].mxu0 %v420_v8 }
 0x372   :  { %v455_v38 = vpop.f32.mrb[8].mxu0 }
 0x373   :  { %v730_v43 = vpop.f32.mrb[9].mxu0 }
 0x374   :  { %v458_v44 = vpop.f32.mrb[10].mxu0 }
 0x375   :  { %v731_v49 = vpop.f32.mrb[11].mxu0 }
 0x392   :  { %v503_v50 = vpop.f32.mrb[12].mxu0 }
 0x393   :  { %772 = vrcp.f32 %v503_v50  ;;  %v750_v55 = vpop.f32.mrb[13].mxu0 }
 0x394   :  { %v506_v56 = vpop.f32.mrb[14].mxu0 }
 0x395   :  { %v751_v11 = vpop.f32.mrb[15].mxu0 }
 0x39d   :  { %v773_v61 = vpop.eup %772 }
 0x39e   :  { %v510_v62 = vmul.f32 %v773_v61, %v455_v38 }
 0x3a0   :  { %v511_v12 = vadd.f32 %v510_v62, %v998_v32 }
 0x3a2   :  { %513 = vrot.lane.b32.xlu0 %v511_v12, %s804_s4  ;;  %v517_v1 = vsel %vm516_vm3, %v511_v12, 0.0  ;;  %v526_v4 = vmul.f32 %v511_v12, %v511_v12 }
 0x3a3   :  { %518 = vadd.xlane.f32.xlu1 %v517_v1 }
 0x3a4   :  { %v528_v5 = vsel %vm516_vm3, %v526_v4, 0.0 }
 0x3a7   :  { %529 = vadd.xlane.f32.xlu1 %v528_v5 }
 0x414   :  { %v514_v13 = vpop.permute.xlu0 %513 }
 0x415   :  { %v527_v14 = vmul.f32 %v514_v13, %v514_v13  ;;  %v520_v15 = vsel %vm516_vm3, %v514_v13, 0.0 }
 0x416   :  { %521 = vadd.xlane.f32.xlu1 %v520_v15 }
 0x417   :  { %v531_v16 = vsel %vm516_vm3, %v527_v14, 0.0 }
 0x41a   :  { %532 = vadd.xlane.f32.xlu1 %v531_v16 }
 0x430   :  { %v519_v18 = vpop.xlane.xlu1 %518 }
 0x431   :  { %v524_v20 = vmul.f32 0.03125, %v519_v18 }
 0x433   :  { %v536_v21 = vmul.f32 %v524_v20, %v524_v20  ;;  %v540_v27 = vsub.f32 %v511_v12, %v524_v20 }
 0x434   :  { %v530_v32 = vpop.xlane.xlu1 %529 }
 0x435   :  { %v534_v22 = vmul.f32 0.03125, %v530_v32 }
 0x437   :  { %v538_v23 = vsub.f32 %v534_v22, %v536_v21 }
 0x439   :  { %v542_v24 = vadd.f32 1e-05, %v538_v23 }
 0x43b   :  { %774 = vrsqrt.f32 %v542_v24 }
 0x445   :  { %v775_v28 = vpop.eup %774 }
 0x446   :  { %v546_v30 = vmul.f32 %v775_v28, %v540_v27 }
 0x448   :  { %v555_v33 = vmul.f32 %v612_v29, %v546_v30 }
 0x44a   :  { %v564_v34 = vadd.f32 %v613_v31, %v555_v33 }
 0x44c   :  { %566 = vst.msk [vmem:[#allocation2] sm:$0xff] %vm516_vm3, %v564_v34 }
 0x4a3   :  { %v522_v35 = vpop.xlane.xlu1 %521 }
 0x4a4   :  { %v525_v36 = vmul.f32 0.03125, %v522_v35 }
 0x4a6   :  { %v537_v40 = vmul.f32 %v525_v36, %v525_v36  ;;  %v541_v46 = vsub.f32 %v514_v13, %v525_v36 }
 0x4a7   :  { %v533_v39 = vpop.xlane.xlu1 %532 }
 0x4a8   :  { %v535_v41 = vmul.f32 0.03125, %v533_v39 }
 0x4aa   :  { %v539_v42 = vsub.f32 %v535_v41, %v537_v40 }
 0x4ac   :  { %v543_v45 = vadd.f32 1e-05, %v539_v42 }
 0x4ae   :  { %776 = vrsqrt.f32 %v543_v45 }
 0x4b8   :  { %v777_v47 = vpop.eup %776 }
 0x4b9   :  { %v547_v48 = vmul.f32 %v777_v47, %v541_v46 }
 0x4bb   :  { %v556_v51 = vmul.f32 %v612_v29, %v547_v48 }
 0x4bd   :  { %v565_v52 = vadd.f32 %v613_v31, %v556_v51 }
 0x4bf   :  { %567 = vst.msk [vmem:[#allocation2 + $0x8] sm:$0xff] %vm516_vm3, %v565_v52 }
 0x4c0   :  { %789 = shalt.err (!%p786_p4)
}
 0x4c1   :  { %s790_s9 = scalar_lea.hbm %s1203_s12, 256 }
 0x4c2   :  { %p791_p5 = scmp.ne.s32.totalorder %s1203_s12, %s790_s9  ;;  %p794_p6 = scmp.lt.u32.totalorder %s790_s9, %s1203_s12 }
 0x4c4   :  { %p796_p7 = pnand %p794_p6, %p791_p5 }
 0x4c6   :  { %799 = shalt.err (!%p796_p7)
}
 0x4c7   :  { %s806_s8 = smov 128   ;;  %s807_s19 = smov 8  }
 0x4c8   :  { %579 = dma.vmem_to_hbm [thread:$0]  %s574_s28, 256, %s1203_s12, [#allocation3], %s806_s8, %s806_s8, %s807_s19  }
 0x4c9   :  { %800 = dma.done.wait [#allocation3], 256  }
 0x4ca   :  { %801 = vsyncadd [#allocation3], 4294967040 }
 0x4cb   :  { %595 = vsyncpa [#allocation3], 1 }

</bundles_post_ra>
